<compile_context>
chip_gen: v7x
topology: tpu7x:2x2x1
jax: 0.10.0
libtpu: 0.0.40
codegen_flags: <defaults>
</compile_context>

<pallas_src>
import functools

import jax
import jax.numpy as jnp
from jax.experimental import pallas as pl
from jax.experimental.pallas import tpu as pltpu

HIDDEN = 256


def _round_up(n: int, m: int) -> int:
    return ((n + m - 1) // m) * m


def actor_kernel(x_ref, w1_ref, b12_ref, w2_ref, w3_ref, tail_ref, out_ref):
    bf16 = jnp.bfloat16
    b12 = b12_ref[...]    # (2, H)       rows: [b1; b2]           (f32)
    tail = tail_ref[...]  # (3, out_pad) rows: [b3; scale; bias]  (f32)

    # fc1 + relu   (bf16 operands, f32 accumulation; cast of x is VPU filler)
    x = x_ref[...].astype(bf16)
    h1 = jnp.dot(x, w1_ref[...], preferred_element_type=jnp.float32)
    h1 = jnp.maximum(h1 + b12[0:1, :], 0.0)
    # fc2 + relu
    h2 = jnp.dot(h1.astype(bf16), w2_ref[...], preferred_element_type=jnp.float32)
    h2 = jnp.maximum(h2 + b12[1:2, :], 0.0)
    # fc_mu + tanh
    mu = jnp.dot(h2.astype(bf16), w3_ref[...], preferred_element_type=jnp.float32)
    mu = jnp.tanh(mu + tail[0:1, :])
    # action rescale, lane-dense store
    out_ref[...] = (mu * tail[1:2, :] + tail[2:3, :]).astype(out_ref.dtype)


def prepare_params(params):
    """One-time layout prep: bf16 casts, lane padding, operand merging."""
    H = HIDDEN
    action_dim = params["w3"].shape[1]
    out_pad = _round_up(action_dim, 128)
    bf16 = jnp.bfloat16

    w1 = params["w1"].astype(bf16)                                   # (obs_dim, H)
    w2 = params["w2"].astype(bf16)                                   # (H, H)
    w3 = jnp.zeros((H, out_pad), bf16).at[:, :action_dim].set(
        params["w3"].astype(bf16))                                   # (H, out_pad)
    b12 = jnp.concatenate(
        [params["b1"].reshape(1, H), params["b2"].reshape(1, H)],
        axis=0).astype(jnp.float32)                                  # (2, H)
    tail = jnp.zeros((3, out_pad), jnp.float32)
    tail = tail.at[0, :action_dim].set(params["b3"].reshape(-1))
    tail = tail.at[1, :action_dim].set(params["action_scale"].reshape(-1))
    tail = tail.at[2, :action_dim].set(params["action_bias"].reshape(-1))
    return dict(w1=w1, b12=b12, w2=w2, w3=w3, tail=tail)


def _tiling(B: int, tile_cap: int):
    """Pick (tile_b, nb, b_pad): tiles <= cap, ragged-friendly, >=2 steps if possible."""
    b_min = _round_up(B, 16)
    nb = max(1, -(-b_min // tile_cap))
    if nb < 2 and b_min >= 32:
        nb = 2  # v7x: give the 'parallel' batch axis two steps to shard over 2 TCs
    tile_b = _round_up(-(-b_min // nb), 16)
    return tile_b, nb, tile_b * nb


def _actor_forward(x, prepped, *, action_dim, tile_cap, out_dtype):
    B, obs_dim = x.shape
    H = HIDDEN
    out_pad = prepped["w3"].shape[1]
    tile_b, nb, b_pad = _tiling(B, tile_cap)

    # Only per-call prep: zero-pad the batch dim (fused by jit; no lane padding).
    x_p = x if b_pad == B else jnp.zeros((b_pad, obs_dim), x.dtype).at[:B].set(x)

    w_bytes = ((prepped["w1"].size + prepped["w2"].size + prepped["w3"].size) * 2
               + (prepped["b12"].size + prepped["tail"].size) * 4)
    cost = pl.CostEstimate(
        flops=2 * b_pad * (obs_dim * H + H * H + H * out_pad),
        transcendentals=b_pad * out_pad,  # tanh
        bytes_accessed=(x_p.size * jnp.dtype(x_p.dtype).itemsize
                        + w_bytes  # resident weights: fetched once
                        + b_pad * out_pad * jnp.dtype(out_dtype).itemsize),
    )

    # Resident operands: constant index_map + single pipeline buffer.
    resident = lambda shape: pl.BlockSpec(shape, lambda i: (0, 0),
                                          pipeline_mode=pl.Buffered(1))

    out = pl.pallas_call(
        actor_kernel,
        out_shape=jax.ShapeDtypeStruct((b_pad, out_pad), out_dtype),
        grid=(nb,),
        in_specs=[
            pl.BlockSpec((tile_b, obs_dim), lambda i: (i, 0)),  # x tile (f32)
            resident((obs_dim, H)),                             # w1 (bf16)
            resident((2, H)),                                   # [b1; b2]
            resident((H, H)),                                   # w2 (bf16)
            resident((H, out_pad)),                             # w3 (bf16, padded)
            resident((3, out_pad)),                             # [b3; scale; bias]
        ],
        out_specs=pl.BlockSpec((tile_b, out_pad), lambda i: (i, 0)),
        compiler_params=pltpu.CompilerParams(
            dimension_semantics=("parallel",)),
        cost_estimate=cost,
    )(x_p, prepped["w1"], prepped["b12"], prepped["w2"], prepped["w3"],
      prepped["tail"])

    return out[:B, :action_dim]


def make_actor_forward(params, *, tile_cap=1024, out_dtype=jnp.float32):
    """Prepare params once, return a jitted forward: x (B, obs_dim) -> (B, act_dim)."""
    action_dim = params["w3"].shape[1]
    prepped = prepare_params(params)
    fwd = jax.jit(functools.partial(_actor_forward, action_dim=action_dim,
                                    tile_cap=tile_cap, out_dtype=out_dtype))
    return lambda x: fwd(x, prepped)


def init_params(key, obs_dim, action_dim):
    """Deterministic synthetic parameter init (mimics nn.Linear fan-in scaling)."""
    ks = jax.random.split(key, 6)

    def linear(kw, kb, fan_in, fan_out):
        bound = 1.0 / jnp.sqrt(fan_in)
        w = jax.random.uniform(kw, (fan_in, fan_out), jnp.float32, -bound, bound)
        b = jax.random.uniform(kb, (1, fan_out), jnp.float32, -bound, bound)
        return w, b

    w1, b1 = linear(ks[0], ks[1], obs_dim, HIDDEN)
    w2, b2 = linear(ks[2], ks[3], HIDDEN, HIDDEN)
    w3, b3 = linear(ks[4], ks[5], HIDDEN, action_dim)

    # Synthetic action space: low = -2, high = +2  =>  scale = 2, bias = 0
    action_scale = jnp.full((1, action_dim), 2.0, dtype=jnp.float32)
    action_bias = jnp.zeros((1, action_dim), dtype=jnp.float32)

    return dict(w1=w1, b1=b1, w2=w2, b2=b2, w3=w3, b3=b3,
                action_scale=action_scale, action_bias=action_bias)


def actor_forward_ref_f32(x, p):
    """Pure-JAX f32 reference (module semantics)."""
    h1 = jax.nn.relu(x @ p["w1"] + p["b1"])
    h2 = jax.nn.relu(h1 @ p["w2"] + p["b2"])
    mu = jnp.tanh(h2 @ p["w3"] + p["b3"])
    return mu * p["action_scale"] + p["action_bias"]


def actor_forward_ref_bf16(x, p):
    """Pure-JAX reference mirroring the kernel's bf16-operand / f32-acc math."""
    bf16 = jnp.bfloat16
    h1 = jax.nn.relu(
        jnp.dot(x.astype(bf16), p["w1"].astype(bf16),
                preferred_element_type=jnp.float32) + p["b1"])
    h2 = jax.nn.relu(
        jnp.dot(h1.astype(bf16), p["w2"].astype(bf16),
                preferred_element_type=jnp.float32) + p["b2"])
    mu = jnp.tanh(
        jnp.dot(h2.astype(bf16), p["w3"].astype(bf16),
                preferred_element_type=jnp.float32) + p["b3"])
    return mu * p["action_scale"] + p["action_bias"]


if __name__ == "__main__":
    key = jax.random.PRNGKey(0)
    k_params, k_x, k_x2 = jax.random.split(key, 3)

    B = 2          # batch
    OBS_DIM = 32   # flattened observation dim
    ACT_DIM = 2    # action dim

    params = init_params(k_params, OBS_DIM, ACT_DIM)
    forward = make_actor_forward(params)

    # Small batch (the RL action-selection path)
    x = jax.random.normal(k_x, (B, OBS_DIM), dtype=jnp.float32)
    out = jax.block_until_ready(forward(x))
    assert out.shape == (B, ACT_DIM)

    ref_bf16 = actor_forward_ref_bf16(x, params)
    assert jnp.allclose(out, ref_bf16, atol=2e-3, rtol=2e-3), \
        "mismatch vs bf16-path reference (small batch)"
    ref_f32 = actor_forward_ref_f32(x, params)
    assert jnp.allclose(out, ref_f32, atol=5e-2, rtol=5e-2), \
        "mismatch vs f32 reference (small batch)"

    # Larger ragged batch: exercises nb >= 2 (v7x dual-TC sharding) and row padding.
    B2 = 300
    x2 = jax.random.normal(k_x2, (B2, OBS_DIM), dtype=jnp.float32)
    out2 = jax.block_until_ready(forward(x2))
    assert out2.shape == (B2, ACT_DIM)
    ref2 = actor_forward_ref_bf16(x2, params)
    assert jnp.allclose(out2, ref2, atol=2e-3, rtol=2e-3), \
        "mismatch vs bf16-path reference (large batch)"

    print("KERNEL_OK")
</pallas_src>

<mosaic_0001>
module attributes {stable_mosaic.version = 11 : i64} {
  func.func @actor_kernel(%arg0: i32, %arg1: memref<16x32xf32, #tpu.memory_space<vmem>>, %arg2: memref<32x256xbf16, #tpu.memory_space<vmem>>, %arg3: memref<2x256xf32, #tpu.memory_space<vmem>>, %arg4: memref<256x256xbf16, #tpu.memory_space<vmem>>, %arg5: memref<256x128xbf16, #tpu.memory_space<vmem>>, %arg6: memref<3x128xf32, #tpu.memory_space<vmem>>, %arg7: memref<16x128xf32, #tpu.memory_space<vmem>>) attributes {dimension_semantics = [#tpu.dimension_semantics<parallel>], iteration_bounds = array<i64: 1>, scalar_prefetch = 0 : i64, scratch_operands = 0 : i64, tpu.core_type = #tpu.core_type<tc>, window_params = [{transform_indices = @transform_0, window_bounds = array<i64: 16, 32>}, {pipeline_mode = #tpu.pipeline_mode<synchronous>, transform_indices = @transform_1, window_bounds = array<i64: 32, 256>}, {pipeline_mode = #tpu.pipeline_mode<synchronous>, transform_indices = @transform_2, window_bounds = array<i64: 2, 256>}, {pipeline_mode = #tpu.pipeline_mode<synchronous>, transform_indices = @transform_3, window_bounds = array<i64: 256, 256>}, {pipeline_mode = #tpu.pipeline_mode<synchronous>, transform_indices = @transform_4, window_bounds = array<i64: 256, 128>}, {pipeline_mode = #tpu.pipeline_mode<synchronous>, transform_indices = @transform_5, window_bounds = array<i64: 3, 128>}, {transform_indices = @transform_6, window_bounds = array<i64: 16, 128>}]} {
    %c0 = arith.constant 0 : index
    %c0_0 = arith.constant 0 : index
    %0 = vector.load %arg3[%c0, %c0_0] : memref<2x256xf32, #tpu.memory_space<vmem>>, vector<2x256xf32>
    %c0_1 = arith.constant 0 : index
    %c0_2 = arith.constant 0 : index
    %1 = vector.load %arg6[%c0_1, %c0_2] : memref<3x128xf32, #tpu.memory_space<vmem>>, vector<3x128xf32>
    %c0_3 = arith.constant 0 : index
    %c0_4 = arith.constant 0 : index
    %2 = vector.load %arg1[%c0_3, %c0_4] : memref<16x32xf32, #tpu.memory_space<vmem>>, vector<16x32xf32>
    %3 = arith.truncf %2 : vector<16x32xf32> to vector<16x32xbf16>
    %c0_5 = arith.constant 0 : index
    %c0_6 = arith.constant 0 : index
    %4 = vector.load %arg2[%c0_5, %c0_6] : memref<32x256xbf16, #tpu.memory_space<vmem>>, vector<32x256xbf16>
    %cst = arith.constant dense<0.000000e+00> : vector<16x256xf32>
    %5 = tpu.matmul %3, %4, %cst {dimension_numbers = #tpu.dot_dimension_numbers<[1], [0], [0], [1], [0, 0, 1, 1], [], []>} : vector<16x32xbf16>, vector<32x256xbf16>, vector<16x256xf32> -> vector<16x256xf32>
    %6 = vector.extract_strided_slice %0 {offsets = [0, 0], sizes = [1, 256], strides = [1, 1]} : vector<2x256xf32> to vector<1x256xf32>
    %7 = vector.broadcast %6 : vector<1x256xf32> to vector<16x256xf32>
    %8 = arith.addf %5, %7 : vector<16x256xf32>
    %cst_7 = arith.constant 0.000000e+00 : f32
    %9 = vector.broadcast %cst_7 : f32 to vector<16x256xf32>
    %10 = arith.maximumf %8, %9 : vector<16x256xf32>
    %11 = arith.truncf %10 : vector<16x256xf32> to vector<16x256xbf16>
    %c0_8 = arith.constant 0 : index
    %c0_9 = arith.constant 0 : index
    %12 = vector.load %arg4[%c0_8, %c0_9] : memref<256x256xbf16, #tpu.memory_space<vmem>>, vector<256x256xbf16>
    %cst_10 = arith.constant dense<0.000000e+00> : vector<16x256xf32>
    %13 = tpu.matmul %11, %12, %cst_10 {dimension_numbers = #tpu.dot_dimension_numbers<[1], [0], [0], [1], [0, 0, 1, 1], [], []>} : vector<16x256xbf16>, vector<256x256xbf16>, vector<16x256xf32> -> vector<16x256xf32>
    %14 = vector.extract_strided_slice %0 {offsets = [1, 0], sizes = [1, 256], strides = [1, 1]} : vector<2x256xf32> to vector<1x256xf32>
    %15 = vector.broadcast %14 : vector<1x256xf32> to vector<16x256xf32>
    %16 = arith.addf %13, %15 : vector<16x256xf32>
    %cst_11 = arith.constant 0.000000e+00 : f32
    %17 = vector.broadcast %cst_11 : f32 to vector<16x256xf32>
    %18 = arith.maximumf %16, %17 : vector<16x256xf32>
    %19 = arith.truncf %18 : vector<16x256xf32> to vector<16x256xbf16>
    %c0_12 = arith.constant 0 : index
    %c0_13 = arith.constant 0 : index
    %20 = vector.load %arg5[%c0_12, %c0_13] : memref<256x128xbf16, #tpu.memory_space<vmem>>, vector<256x128xbf16>
    %cst_14 = arith.constant dense<0.000000e+00> : vector<16x128xf32>
    %21 = tpu.matmul %19, %20, %cst_14 {dimension_numbers = #tpu.dot_dimension_numbers<[1], [0], [0], [1], [0, 0, 1, 1], [], []>} : vector<16x256xbf16>, vector<256x128xbf16>, vector<16x128xf32> -> vector<16x128xf32>
    %22 = vector.extract_strided_slice %1 {offsets = [0, 0], sizes = [1, 128], strides = [1, 1]} : vector<3x128xf32> to vector<1x128xf32>
    %23 = vector.broadcast %22 : vector<1x128xf32> to vector<16x128xf32>
    %24 = arith.addf %21, %23 : vector<16x128xf32>
    %25 = math.tanh %24 : vector<16x128xf32>
    %26 = vector.extract_strided_slice %1 {offsets = [1, 0], sizes = [1, 128], strides = [1, 1]} : vector<3x128xf32> to vector<1x128xf32>
    %27 = vector.broadcast %26 : vector<1x128xf32> to vector<16x128xf32>
    %28 = arith.mulf %25, %27 : vector<16x128xf32>
    %29 = vector.extract_strided_slice %1 {offsets = [2, 0], sizes = [1, 128], strides = [1, 1]} : vector<3x128xf32> to vector<1x128xf32>
    %30 = vector.broadcast %29 : vector<1x128xf32> to vector<16x128xf32>
    %31 = arith.addf %28, %30 : vector<16x128xf32>
    %c0_15 = arith.constant 0 : index
    %c0_16 = arith.constant 0 : index
    %32 = vector.load %arg7[%c0_15, %c0_16] : memref<16x128xf32, #tpu.memory_space<vmem>>, vector<16x128xf32>
    tpu.vector_store %arg7[%c0_15, %c0_16], %31 {strides = array<i32>} : memref<16x128xf32, #tpu.memory_space<vmem>>, vector<16x128xf32>,
    return
  }
  func.func @transform_0(%arg0: i32) -> (i32, i32) {
    %c0_i32 = arith.constant 0 : i32
    %c0_i32_0 = arith.constant 0 : i32
    return %arg0, %c0_i32 : i32, i32
  }
  func.func @transform_1(%arg0: i32) -> (i32, i32) {
    %c0_i32 = arith.constant 0 : i32
    %c0_i32_0 = arith.constant 0 : i32
    %c0_i32_1 = arith.constant 0 : i32
    return %c0_i32, %c0_i32_0 : i32, i32
  }
  func.func @transform_2(%arg0: i32) -> (i32, i32) {
    %c0_i32 = arith.constant 0 : i32
    %c0_i32_0 = arith.constant 0 : i32
    %c0_i32_1 = arith.constant 0 : i32
    return %c0_i32, %c0_i32_0 : i32, i32
  }
  func.func @transform_3(%arg0: i32) -> (i32, i32) {
    %c0_i32 = arith.constant 0 : i32
    %c0_i32_0 = arith.constant 0 : i32
    %c0_i32_1 = arith.constant 0 : i32
    return %c0_i32, %c0_i32_0 : i32, i32
  }
  func.func @transform_4(%arg0: i32) -> (i32, i32) {
    %c0_i32 = arith.constant 0 : i32
    %c0_i32_0 = arith.constant 0 : i32
    %c0_i32_1 = arith.constant 0 : i32
    return %c0_i32, %c0_i32_0 : i32, i32
  }
  func.func @transform_5(%arg0: i32) -> (i32, i32) {
    %c0_i32 = arith.constant 0 : i32
    %c0_i32_0 = arith.constant 0 : i32
    %c0_i32_1 = arith.constant 0 : i32
    return %c0_i32, %c0_i32_0 : i32, i32
  }
  func.func @transform_6(%arg0: i32) -> (i32, i32) {
    %c0_i32 = arith.constant 0 : i32
    %c0_i32_0 = arith.constant 0 : i32
    return %arg0, %c0_i32 : i32, i32
  }
}

</mosaic_0001>

<bundles_post_ra>
// kernel: _actor_forward.1
= control target key start
LH: loop header
LB: loop body
LE: loop exit
PB: predicated region body
PF: predicated region fallthrough
CT: control target
= control target key end

     0   :  { %11 = vsyncpa [#allocation3], 0  ;;  %s961_s0 = inlined_call_operand.vmem [shape: f32[16,32], index: 0, kind: input, shape index: {}]   ;;  %s962_s1 = inlined_call_operand.hbm [shape: bf16[32,256], index: 1, kind: input, shape index: {}]   ;;  %s963_s2 = inlined_call_operand.vmem [shape: f32[2,256], index: 2, kind: input, shape index: {}]   ;;  %s964_s3 = inlined_call_operand.hbm [shape: bf16[256,256], index: 3, kind: input, shape index: {}]   ;;  %s965_s4 = inlined_call_operand.hbm [shape: bf16[256,128], index: 4, kind: input, shape index: {}]   ;;  %s966_s5 = inlined_call_operand.vmem [shape: f32[3,128], index: 5, kind: input, shape index: {}]   ;;  %s967_s6 = inlined_call_operand.vmem [shape: f32[16,128], index: 6, kind: output, shape index: {}]  }
   0x1   :  { %12 = vsyncpa [#allocation5], 0  ;;  %s847_s21 = smov [#allocation4]   ;;  %s848_s23 = smov [#allocation2]  }
   0x2   :  { %s34_s22 = sshll.u32 %s847_s21, 4  ;;  %s20_s24 = sshll.u32 %s848_s23, 4  ;;  %s35_s22 = int_to_ptr.vmem [resolvable:$true] %s34_s22  ;;  %s890_s24 = int_to_ptr.vmem [resolvable:$true] %s20_s24 }
   0x3   :  { %s777_s27 = scalar_lea.hbm %s964_s3, 4096 }
   0x4   :  { %p778_p0 = scmp.ne.s32.totalorder %s964_s3, %s777_s27  ;;  %p781_p1 = scmp.lt.u32.totalorder %s777_s27, %s964_s3 }
   0x6   :  { %p783_p2 = pnand %p781_p1, %p778_p0 }
   0x8   :  { %786 = shalt.err (!%p783_p2)
}
   0x9   :  { %s787_s8 = scalar_lea.vmem %s35_s22, 4096  ;;  %p792_p4 = scmp.lt.s32.totalorder %s35_s22, %s35_s22 }
   0xa   :  { %p788_p3 = scmp.ne.s32.totalorder %s35_s22, %s787_s8  ;;  %p793_p5 = scmp.lt.s32.totalorder %s787_s8, %s787_s8 }
   0xc   :  { %p794_p6 = por %p793_p5, %p792_p4 }
   0xe   :  { %p795_p7 = pnand %p794_p6, %p788_p3 }
  0x10   :  { %798 = shalt.err (!%p795_p7)
}
  0x11   :  { %s849_s9 = smov 128   ;;  %s850_s10 = smov 8  }
  0x12   :  { %40 = dma.hbm_to_vmem [thread:$0]  %s964_s3, 4096, %s35_s22, [#allocation5], %s849_s9, %s849_s9, %s850_s10  }
  0x13   :  { %s799_s15 = scalar_lea.hbm %s962_s1, 512 }
  0x14   :  { %p800_p8 = scmp.ne.s32.totalorder %s962_s1, %s799_s15  ;;  %p803_p9 = scmp.lt.u32.totalorder %s799_s15, %s962_s1 }
  0x16   :  { %p805_p10 = pnand %p803_p9, %p800_p8 }
  0x18   :  { %808 = shalt.err (!%p805_p10)
}
  0x19   :  { %s809_s20 = scalar_lea.vmem %s890_s24, 512  ;;  %p814_p12 = scmp.lt.s32.totalorder %s890_s24, %s890_s24 }
  0x1a   :  { %p810_p11 = scmp.ne.s32.totalorder %s890_s24, %s809_s20  ;;  %p815_p13 = scmp.lt.s32.totalorder %s809_s20, %s809_s20 }
  0x1c   :  { %p816_p0 = por %p815_p13, %p814_p12 }
  0x1e   :  { %p817_p1 = pnand %p816_p0, %p810_p11 }
  0x20   :  { %820 = shalt.err (!%p817_p1)
}
  0x21   :  { %26 = dma.hbm_to_vmem [thread:$0]  %s962_s1, 512, %s890_s24, [#allocation3], %s849_s9, %s849_s9, %s850_s10  }
  0x22   :  { %s851_s22 = smov [#allocation6]   ;;  %s821_s27 = scalar_lea.hbm %s965_s4, 2048 }
  0x23   :  { %s46_s23 = sshll.u32 %s851_s22, 4  ;;  %p822_p2 = scmp.ne.s32.totalorder %s965_s4, %s821_s27  ;;  %s47_s23 = int_to_ptr.vmem [resolvable:$true] %s46_s23 }
  0x24   :  { %p825_p3 = scmp.lt.u32.totalorder %s821_s27, %s965_s4 }
  0x26   :  { %p827_p4 = pnand %p825_p3, %p822_p2 }
  0x28   :  { %830 = shalt.err (!%p827_p4)
}
  0x29   :  { %s831_s8 = scalar_lea.vmem %s47_s23, 2048  ;;  %p836_p6 = scmp.lt.s32.totalorder %s47_s23, %s47_s23 }
  0x2a   :  { %p832_p5 = scmp.ne.s32.totalorder %s47_s23, %s831_s8  ;;  %p837_p7 = scmp.lt.s32.totalorder %s831_s8, %s831_s8 }
  0x2c   :  { %p838_p8 = por %p837_p7, %p836_p6 }
  0x2e   :  { %p839_p9 = pnand %p838_p8, %p832_p5 }
  0x30   :  { %842 = shalt.err (!%p839_p9)
}
  0x31   :  { %s852_s1 = smov 64   ;;  %s853_s24 = smov 4  }
  0x32   :  { %52 = dma.hbm_to_vmem [thread:$0]  %s965_s4, 2048, %s47_s23, [#allocation5], %s852_s1, %s852_s1, %s853_s24  }
  0x33   :  { %843 = dma.done.wait [#allocation3], 512  }
  0x34   :  { %844 = vsyncadd [#allocation3], 4294966784 }
  0x35   :  { %845 = dma.done.wait [#allocation5], 6144  }
  0x36   :  { %846 = vsyncadd [#allocation5], 4294961152  ;;  %v854_v0 = vmov 0   ;;  %v703_v1 = vld [vmem:[#allocation2 + $0x4] ss:$8 sps:$4 sm:$0xff]   ;;  %vm113_vm0 = vcmask 261120   ;;  %v75_v51 = vlaneseq }
  0x37   :  { %149 = vmatprep.mubr.bf16.mxu0 %v854_v0  ;;  %v705_v2 = vld [vmem:[#allocation2] ss:$8 sps:$4 sm:$0xff]   ;;  %117 = vmatprep.subr.bf16.mxu0 %v703_v1  ;;  %v706_v3 = vld [vmem:[#allocation2 + $0x14] ss:$8 sps:$4 sm:$0xff]   ;;  %v708_v4 = vld [vmem:[#allocation2 + $0x10] ss:$8 sps:$4 sm:$0xff]  }
  0x38   :  { %v67_v5 = vld [vmem:[%s961_s0] sm:$0xff]  ;;  %118 = vmatpush1.bf16.msra.mxu0 %v705_v2  ;;  %v68_v6 = vld [vmem:[%s961_s0 + $0x8] sm:$0xff]  ;;  %v712_v9 = vld [vmem:[#allocation4 + $0x14] ss:$8 sps:$4 sm:$0xff]   ;;  %v939_v52 = vshrl.u32 %v75_v51, 7 }
  0x39   :  { %119 = vmatprep.subr.bf16.mxu0 %v706_v3  ;;  %v709_v7 = vld [vmem:[#allocation4 + $0x4] ss:$8 sps:$4 sm:$0xff]   ;;  %v711_v8 = vld [vmem:[#allocation4] ss:$8 sps:$4 sm:$0xff]   ;;  %v69_v10 = vpack.c.bf16 %v68_v6, %v67_v5  ;;  %v714_v11 = vld [vmem:[#allocation4 + $0x10] ss:$8 sps:$4 sm:$0xff]  }
  0x3a   :  { %376 = vmatprep.subr.bf16.mxu1 %v709_v7  ;;  %v715_v12 = vld [vmem:[#allocation4 + $0x24] ss:$8 sps:$4 sm:$0xff]   ;;  %v717_v13 = vld [vmem:[#allocation4 + $0x20] ss:$8 sps:$4 sm:$0xff]   ;;  %v718_v14 = vld [vmem:[#allocation4 + $0x34] ss:$8 sps:$4 sm:$0xff]  }
  0x3b   :  { %377 = vmatpush1.bf16.msra.mxu1 %v711_v8  ;;  %v720_v15 = vld [vmem:[#allocation4 + $0x30] ss:$8 sps:$4 sm:$0xff]   ;;  %v721_v16 = vld [vmem:[#allocation4 + $0x44] ss:$8 sps:$4 sm:$0xff]   ;;  %v723_v17 = vld [vmem:[#allocation4 + $0x40] ss:$8 sps:$4 sm:$0xff]  }
  0x3c   :  { %120 = vmatpush1.bf16.msra.mxu0 %v708_v4  ;;  %378 = vmatprep.subr.bf16.mxu1 %v712_v9  ;;  %v724_v18 = vld [vmem:[#allocation4 + $0x54] ss:$8 sps:$4 sm:$0xff]   ;;  %v726_v19 = vld [vmem:[#allocation4 + $0x50] ss:$8 sps:$4 sm:$0xff]   ;;  %v727_v20 = vld [vmem:[#allocation4 + $0x64] ss:$8 sps:$4 sm:$0xff]  }
  0x3d   :  { %v729_v21 = vld [vmem:[#allocation4 + $0x60] ss:$8 sps:$4 sm:$0xff]   ;;  %v730_v22 = vld [vmem:[#allocation4 + $0x74] ss:$8 sps:$4 sm:$0xff]   ;;  %v732_v23 = vld [vmem:[#allocation4 + $0x70] ss:$8 sps:$4 sm:$0xff]  }
  0x3e   :  { %v733_v24 = vld [vmem:[#allocation4 + $0x84] ss:$8 sps:$4 sm:$0xff]   ;;  %v735_v25 = vld [vmem:[#allocation4 + $0x80] ss:$8 sps:$4 sm:$0xff]   ;;  %v736_v26 = vld [vmem:[#allocation4 + $0x94] ss:$8 sps:$4 sm:$0xff]  }
  0x3f   :  { %624 = vmatmul.mubr.msk.bf16.vlgmr.msra.gmra.mrb[0].mxu0 %vm113_vm0, %v69_v10  ;;  %379 = vmatpush1.bf16.msra.mxu1 %v714_v11  ;;  %v738_v27 = vld [vmem:[#allocation4 + $0x90] ss:$8 sps:$4 sm:$0xff]   ;;  %v739_v28 = vld [vmem:[#allocation4 + $0xa4] ss:$8 sps:$4 sm:$0xff]   ;;  %v741_v29 = vld [vmem:[#allocation4 + $0xa0] ss:$8 sps:$4 sm:$0xff]  }
  0x40   :  { %380 = vmatprep.subr.bf16.mxu1 %v715_v12  ;;  %v742_v30 = vld [vmem:[#allocation4 + $0xb4] ss:$8 sps:$4 sm:$0xff]   ;;  %v744_v31 = vld [vmem:[#allocation4 + $0xb0] ss:$8 sps:$4 sm:$0xff]   ;;  %v745_v32 = vld [vmem:[#allocation4 + $0xc4] ss:$8 sps:$4 sm:$0xff]  }
  0x41   :  { %v747_v33 = vld [vmem:[#allocation4 + $0xc0] ss:$8 sps:$4 sm:$0xff]   ;;  %v748_v34 = vld [vmem:[#allocation4 + $0xd4] ss:$8 sps:$4 sm:$0xff]   ;;  %v750_v35 = vld [vmem:[#allocation4 + $0xd0] ss:$8 sps:$4 sm:$0xff]  }
  0x42   :  { %v751_v36 = vld [vmem:[#allocation4 + $0xe4] ss:$8 sps:$4 sm:$0xff]   ;;  %v753_v37 = vld [vmem:[#allocation4 + $0xe0] ss:$8 sps:$4 sm:$0xff]   ;;  %v754_v38 = vld [vmem:[#allocation4 + $0xf4] ss:$8 sps:$4 sm:$0xff]  }
  0x43   :  { %381 = vmatpush1.bf16.msra.mxu1 %v717_v13  ;;  %v756_v39 = vld [vmem:[#allocation4 + $0xf0] ss:$8 sps:$4 sm:$0xff]   ;;  %v757_v40 = vld [vmem:[#allocation6 + $0x40] sm:$0xff]   ;;  %v759_v42 = vld [vmem:[#allocation6 + $0x48] sm:$0xff]   ;;  %v77_v53 = vsub.s32 0, %v939_v52  ;;  %v81_v55 = vsub.s32 2, %v939_v52 }
  0x44   :  { %382 = vmatprep.subr.bf16.mxu1 %v718_v14  ;;  %v758_v41 = vld [vmem:[#allocation6] sm:$0xff]   ;;  %673 = vmatprep.subr.bf16.mxu0 %v757_v40  ;;  %v760_v43 = vld [vmem:[#allocation6 + $0x8] sm:$0xff]   ;;  %v761_v44 = vld [vmem:[#allocation6 + $0x50] sm:$0xff]  }
  0x45   :  { %674 = vmatpush3.bf16.msra.mxu0 %v758_v41  ;;  %v762_v45 = vld [vmem:[#allocation6 + $0x10] sm:$0xff]   ;;  %v763_v46 = vld [vmem:[#allocation6 + $0x58] sm:$0xff]   ;;  %v765_v48 = vld [vmem:[#allocation6 + $0x60] sm:$0xff]  }
  0x46   :  { %675 = vmatprep.subr.bf16.mxu0 %v759_v42  ;;  %v764_v47 = vld [vmem:[#allocation6 + $0x18] sm:$0xff]   ;;  %v766_v49 = vld [vmem:[#allocation6 + $0x20] sm:$0xff]   ;;  %v767_v50 = vld [vmem:[#allocation6 + $0x68] sm:$0xff]  }
  0x47   :  { %383 = vmatpush1.bf16.msra.mxu1 %v720_v15  ;;  %v65_v54 = vld [vmem:[%s963_s2] sm:$0xf]  ;;  %v768_v10 = vld [vmem:[#allocation6 + $0x28] sm:$0xff]   ;;  %v769_v11 = vld [vmem:[#allocation6 + $0x70] sm:$0xff]   ;;  %v200_v15 = vsub.s32 1, %v939_v52 }
  0x48   :  { %384 = vmatprep.subr.bf16.mxu1 %v721_v16  ;;  %v78_v56 = vrot.slane %v65_v54, %v77_v53  ;;  %v82_v57 = vrot.slane %v65_v54, %v81_v55  ;;  %v770_v12 = vld [vmem:[#allocation6 + $0x30] sm:$0xff]   ;;  %v771_v13 = vld [vmem:[#allocation6 + $0x78] sm:$0xff]   ;;  %v204_v16 = vsub.s32 3, %v939_v52 }
  0x49   :  { %676 = vmatpush3.bf16.msra.mxu0 %v760_v43  ;;  %v772_v14 = vld [vmem:[#allocation6 + $0x38] sm:$0xff]  }
  0x4a   :  { %677 = vmatprep.subr.bf16.mxu0 %v761_v44  ;;  %v88_v58 = vrot.slane %v78_v56, %v77_v53  ;;  %v92_v59 = vrot.slane %v82_v57, %v77_v53 }
  0x4b   :  { %385 = vmatpush1.bf16.msra.mxu1 %v723_v17  ;;  %v201_v17 = vrot.slane %v65_v54, %v200_v15 }
  0x4c   :  { %386 = vmatprep.subr.bf16.mxu1 %v724_v18  ;;  %v205_v18 = vrot.slane %v65_v54, %v204_v16 }
  0x4d   :  { %678 = vmatpush3.bf16.msra.mxu0 %v762_v45 }
  0x4e   :  { %679 = vmatprep.subr.bf16.mxu0 %v763_v46 }
  0x4f   :  { %387 = vmatpush1.bf16.msra.mxu1 %v726_v19  ;;  %v211_v19 = vrot.slane %v201_v17, %v200_v15 }
  0x50   :  { %388 = vmatprep.subr.bf16.mxu1 %v727_v20  ;;  %v215_v20 = vrot.slane %v205_v18, %v200_v15 }
  0x51   :  { %680 = vmatpush3.bf16.msra.mxu0 %v764_v47 }
  0x52   :  { %681 = vmatprep.subr.bf16.mxu0 %v765_v48 }
  0x53   :  { %389 = vmatpush1.bf16.msra.mxu1 %v729_v21 }
  0x54   :  { %390 = vmatprep.subr.bf16.mxu1 %v730_v22 }
  0x55   :  { %682 = vmatpush3.bf16.msra.mxu0 %v766_v49 }
  0x56   :  { %683 = vmatprep.subr.bf16.mxu0 %v767_v50 }
  0x57   :  { %391 = vmatpush1.bf16.msra.mxu1 %v732_v23 }
  0x58   :  { %392 = vmatprep.subr.bf16.mxu1 %v733_v24 }
  0x59   :  { %684 = vmatpush3.bf16.msra.mxu0 %v768_v10 }
  0x5a   :  { %685 = vmatprep.subr.bf16.mxu0 %v769_v11 }
  0x5b   :  { %393 = vmatpush1.bf16.msra.mxu1 %v735_v25 }
  0x5c   :  { %394 = vmatprep.subr.bf16.mxu1 %v736_v26 }
  0x5d   :  { %686 = vmatpush3.bf16.msra.mxu0 %v770_v12 }
  0x5e   :  { %687 = vmatprep.subr.bf16.mxu0 %v771_v13 }
  0x5f   :  { %395 = vmatpush1.bf16.msra.mxu1 %v738_v27 }
  0x60   :  { %396 = vmatprep.subr.bf16.mxu1 %v739_v28 }
  0x61   :  { %688 = vmatpush3.bf16.msra.mxu0 %v772_v14 }
  0x63   :  { %397 = vmatpush1.bf16.msra.mxu1 %v741_v29 }
  0x64   :  { %398 = vmatprep.subr.bf16.mxu1 %v742_v30 }
  0x67   :  { %399 = vmatpush1.bf16.msra.mxu1 %v744_v31 }
  0x68   :  { %400 = vmatprep.subr.bf16.mxu1 %v745_v32 }
  0x6b   :  { %401 = vmatpush1.bf16.msra.mxu1 %v747_v33 }
  0x6c   :  { %402 = vmatprep.subr.bf16.mxu1 %v748_v34 }
  0x6f   :  { %403 = vmatpush1.bf16.msra.mxu1 %v750_v35  ;;  %v66_v35 = vld [vmem:[%s966_s5] sm:$0x7] }
  0x70   :  { %404 = vmatprep.subr.bf16.mxu1 %v751_v36  ;;  %v603_v45 = vrot.slane %v66_v35, %v200_v15  ;;  %v609_v46 = vrot.slane %v66_v35, %v81_v55 }
  0x73   :  { %405 = vmatpush1.bf16.msra.mxu1 %v753_v37  ;;  %v460_v37 = vrot.slane %v66_v35, %v77_v53 }
  0x74   :  { %406 = vmatprep.subr.bf16.mxu1 %v754_v38 }
  0x77   :  { %407 = vmatpush1.bf16.msra.mxu1 %v756_v39 }
 0x112   :  { %v151_v60 = vpop.f32.mrb[0].mxu0 }
 0x113   :  { %v152_v61 = vadd.f32 %v151_v60, %v88_v58  ;;  %v153_v62 = vpop.f32.mrb[1].mxu0 }
 0x114   :  { %v154_v63 = vadd.f32 %v153_v62, %v92_v59  ;;  %v155_v0 = vpop.f32.mrb[2].mxu0 }
 0x115   :  { %v156_v1 = vadd.f32 %v155_v0, %v88_v58  ;;  %v157_v2 = vpop.f32.mrb[3].mxu0  ;;  %v160_v4 = vmax.f32 %v152_v61, 0.0 }
 0x116   :  { %v158_v3 = vadd.f32 %v157_v2, %v92_v59  ;;  %v161_v6 = vmax.f32 %v154_v63, 0.0 }
 0x117   :  { %v162_v5 = vmax.f32 %v156_v1, 0.0 }
 0x118   :  { %v163_v7 = vmax.f32 %v158_v3, 0.0 }
 0x119   :  { %v164_v8 = vpack.c.bf16 %v162_v5, %v160_v4 }
 0x11a   :  { %v165_v9 = vpack.c.bf16 %v163_v7, %v161_v6 }
 0x11c   :  { %408 = vmatprep.mubr.bf16.mxu1 %v165_v9 }
 0x11d   :  { %409 = vmatmul.mubr.bf16.vlgmr.msra.gmra.mrb[0].mxu1 %v164_v8 }
 0x1f0   :  { %v410_v21 = vpop.f32.mrb[0].mxu1 }
 0x1f1   :  { %v411_v22 = vadd.f32 %v410_v21, %v211_v19  ;;  %v412_v23 = vpop.f32.mrb[1].mxu1 }
 0x1f2   :  { %v413_v24 = vadd.f32 %v412_v23, %v215_v20  ;;  %v414_v25 = vpop.f32.mrb[2].mxu1 }
 0x1f3   :  { %v415_v26 = vadd.f32 %v414_v25, %v211_v19  ;;  %v416_v27 = vpop.f32.mrb[3].mxu1  ;;  %v419_v29 = vmax.f32 %v411_v22, 0.0 }
 0x1f4   :  { %v417_v28 = vadd.f32 %v416_v27, %v215_v20  ;;  %v420_v31 = vmax.f32 %v413_v24, 0.0 }
 0x1f5   :  { %v421_v30 = vmax.f32 %v415_v26, 0.0 }
 0x1f6   :  { %v422_v32 = vmax.f32 %v417_v28, 0.0 }
 0x1f7   :  { %v423_v33 = vpack.c.bf16 %v421_v30, %v419_v29 }
 0x1f8   :  { %v424_v34 = vpack.c.bf16 %v422_v32, %v420_v31 }
 0x1fa   :  { %589 = vmatprep.mubr.bf16.mxu0 %v424_v34 }
 0x1fb   :  { %590 = vmatmul.mubr.bf16.vlgmr.msra.gmra.mrb[4].mxu0 %v423_v33 }
 0x2ce   :  { %v689_v36 = vpop.f32.mrb[4].mxu0 }
 0x2cf   :  { %v690_v38 = vpop.f32.mrb[5].mxu0 }
 0x2d0   :  { %v691_v39 = vadd.f32 %v690_v38, %v689_v36  ;;  %v692_v40 = vpop.f32.mrb[6].mxu0 }
 0x2d1   :  { %v693_v41 = vpop.f32.mrb[7].mxu0 }
 0x2d2   :  { %v592_v42 = vadd.f32 %v691_v39, %v460_v37  ;;  %v694_v43 = vadd.f32 %v693_v41, %v692_v40 }
 0x2d4   :  { %773 = vtanh.f32 %v592_v42  ;;  %v595_v44 = vadd.f32 %v694_v43, %v460_v37 }
 0x2d6   :  { %775 = vtanh.f32 %v595_v44 }
 0x2de   :  { %v774_v47 = vpop.eup %773 }
 0x2df   :  { %v604_v48 = vmul.f32 %v774_v47, %v603_v45 }
 0x2e0   :  { %v776_v49 = vpop.eup %775 }
 0x2e1   :  { %v610_v50 = vadd.f32 %v609_v46, %v604_v48  ;;  %v605_v51 = vmul.f32 %v776_v49, %v603_v45 }
 0x2e3   :  { %612 = vst [vmem:[%s967_s6] sm:$0xff] %v610_v50  ;;  %v611_v53 = vadd.f32 %v609_v46, %v605_v51 }
 0x2e5   :  { %613 = vst [vmem:[%s967_s6 + $0x8] sm:$0xff] %v611_v53 }
 0x2e6   :  { %618 = vsyncpa [#allocation3], 1 }
 0x2e7   :  { %619 = vsyncpa [#allocation5], 1 }

</bundles_post_ra>
